<compile_context>
chip_gen: v6e
topology: v6e:2x2x1
jax: 0.10.0
libtpu: 0.0.40
codegen_flags: <defaults>
</compile_context>

<pallas_src>
import functools

import jax
import jax.numpy as jnp
from jax.experimental import pallas as pl
from jax.experimental.pallas import tpu as pltpu


def _sgu_kernel(u_ref, v_ref, scale_ref, shift_ref, wt_ref, bias_ref, o_ref,
                *, flatten):
    # u_ref, v_ref : (bt, C/2, L)  batch tile of the two channel halves of x
    # scale_ref    : (C/2, 1)      folded BN scale = gamma * rsqrt(var + eps)
    # shift_ref    : (C/2, 1)      folded BN shift = beta - mean * scale
    # wt_ref       : (L, L)        Linear weight, pre-transposed to (in, out)
    # bias_ref     : (1, L)        Linear bias
    # o_ref        : (bt, C/2, L)
    bt, half_ch, L = o_ref.shape
    scale = scale_ref[...]
    shift = shift_ref[...]
    wt = wt_ref[...]
    bias = bias_ref[...]

    if flatten:
        # C/2 multiple of 8: collapsing (bt, C/2) into the sublane axis is a
        # layout no-op, so do one tall MXU matmul for the whole batch tile.
        u = u_ref[...].astype(jnp.float32)                      # (bt, C/2, L)
        v = v_ref[...].astype(jnp.float32)
        v_norm = (v * scale + shift).astype(wt.dtype)
        proj = jnp.dot(v_norm.reshape(bt * half_ch, L), wt,
                       preferred_element_type=jnp.float32) + bias
        o_ref[...] = (u * proj.reshape(bt, half_ch, L)).astype(o_ref.dtype)
    else:
        # Unaligned C/2: statically unrolled per-batch 2D matmuls.
        for i in range(bt):
            u = u_ref[i].astype(jnp.float32)                    # (C/2, L)
            v = v_ref[i].astype(jnp.float32)
            v_norm = (v * scale + shift).astype(wt.dtype)
            proj = jnp.dot(v_norm, wt,
                           preferred_element_type=jnp.float32) + bias
            o_ref[i] = (u * proj).astype(o_ref.dtype)


def _pick_batch_tile(batch, half_ch, seq, itemsize, budget_bytes=8 * 1024 * 1024):
    """Largest divisor of `batch` whose u+v+out tiles (double-buffered) fit budget."""
    per_batch = 3 * half_ch * seq * itemsize * 2
    cap = max(1, budget_bytes // max(per_batch, 1))
    bt = 1
    for cand in range(1, min(batch, cap) + 1):
        if batch % cand == 0:
            bt = cand
    return bt


def spatial_gating_unit(x, gamma, beta, running_mean, running_var, w, b,
                        *, eps=1e-5, use_batch_stats=True):
    """Forward pass of SpatialGatingUnit.

    x: (B, C, L); gamma/beta/running_mean/running_var: (C//2,);
    w: (L, L) Linear weight (out, in); b: (L,) Linear bias.
    use_batch_stats=True matches PyTorch training-mode BatchNorm (batch
    statistics); False matches eval mode (running statistics).
    """
    B, C, L = x.shape
    assert C % 2 == 0, C
    half_ch = C // 2
    assert w.shape == (L, L) and b.shape == (L,)

    if use_batch_stats:
        # TODO(synk): the per-channel batch mean/var is a tiny O(C/2)-output
        # plain-JAX pre-pass over v; fold into a small Pallas reduction kernel
        # if this pass ever shows up in profiles.
        v = x[:, half_ch:, :]
        mean = jnp.mean(v, axis=(0, 2))
        var = jnp.mean(jnp.square(v - mean[None, :, None]), axis=(0, 2))  # biased (BN)
    else:
        mean, var = running_mean, running_var

    scale = (gamma * jax.lax.rsqrt(var + eps)).astype(jnp.float32)     # (C/2,)
    shift = beta.astype(jnp.float32) - mean.astype(jnp.float32) * scale

    compute_dtype = jnp.bfloat16 if x.dtype == jnp.bfloat16 else jnp.float32
    scale2d = scale.reshape(half_ch, 1)
    shift2d = shift.reshape(half_ch, 1)
    wt = jnp.transpose(w).astype(compute_dtype)                        # (L_in, L_out)
    bias2d = b.reshape(1, L).astype(jnp.float32)

    # Free metadata reshape: split the channel axis so u/v become DMA-level
    # block indices instead of in-kernel slices.
    x4 = x.reshape(B, 2, half_ch, L)

    bt = _pick_batch_tile(B, half_ch, L, x.dtype.itemsize)
    flatten = (half_ch % 8 == 0)
    kernel = functools.partial(_sgu_kernel, flatten=flatten)

    out = pl.pallas_call(
        kernel,
        out_shape=jax.ShapeDtypeStruct((B, half_ch, L), x.dtype),
        grid_spec=pltpu.PrefetchScalarGridSpec(
            num_scalar_prefetch=0,
            grid=(B // bt,),
            in_specs=[
                pl.BlockSpec((bt, None, half_ch, L), lambda i: (i, 0, 0, 0)),  # u
                pl.BlockSpec((bt, None, half_ch, L), lambda i: (i, 1, 0, 0)),  # v
                pl.BlockSpec((half_ch, 1), lambda i: (0, 0)),   # BN scale (resident)
                pl.BlockSpec((half_ch, 1), lambda i: (0, 0)),   # BN shift (resident)
                pl.BlockSpec((L, L), lambda i: (0, 0)),         # Linear W^T (resident)
                pl.BlockSpec((1, L), lambda i: (0, 0)),         # Linear bias (resident)
            ],
            out_specs=pl.BlockSpec((bt, half_ch, L), lambda i: (i, 0, 0)),
        ),
        compiler_params=pltpu.CompilerParams(
            dimension_semantics=("parallel",),
        ),
    )(x4, x4, scale2d, shift2d, wt, bias2d)
    return out


def _ref_sgu(x, gamma, beta, rm, rv, w, b, eps, use_batch_stats):
    ch = x.shape[1] // 2
    u, v = x[:, :ch, :], x[:, ch:, :]
    if use_batch_stats:
        mean = v.mean(axis=(0, 2))
        var = jnp.square(v - mean[None, :, None]).mean(axis=(0, 2))
    else:
        mean, var = rm, rv
    v_n = (v - mean[None, :, None]) * jax.lax.rsqrt(var[None, :, None] + eps)
    v_n = v_n * gamma[None, :, None] + beta[None, :, None]
    proj = jnp.einsum("bcl,ol->bco", v_n, w) + b[None, None, :]
    return u * proj


if __name__ == "__main__":
    eps = 1e-5
    # (B, C, L): small unaligned case (per-batch loop path) and a sublane-aligned
    # case that exercises the flattened single-matmul path.
    for case_idx, (B, C, L) in enumerate([(2, 4, 16), (4, 16, 128)]):
        half_ch = C // 2
        key = jax.random.PRNGKey(0)
        k_x, k_g, k_b, k_w = jax.random.split(key, 4)

        x = jax.random.normal(k_x, (B, C, L), dtype=jnp.float32)
        gamma = jax.random.uniform(k_g, (half_ch,), jnp.float32, 0.5, 1.5)
        beta = 0.1 * jax.random.normal(k_b, (half_ch,), dtype=jnp.float32)
        running_mean = jnp.zeros((half_ch,), jnp.float32)
        running_var = jnp.ones((half_ch,), jnp.float32)
        # nn.Linear(dims, dims) default init: U(-1/sqrt(dims), 1/sqrt(dims)); bias init 1.
        bound = 1.0 / (L ** 0.5)
        w = jax.random.uniform(k_w, (L, L), jnp.float32, -bound, bound)
        b = jnp.ones((L,), jnp.float32)

        for use_batch_stats in (True, False):   # training- and eval-mode BatchNorm
            out = spatial_gating_unit(x, gamma, beta, running_mean, running_var,
                                      w, b, eps=eps, use_batch_stats=use_batch_stats)
            out = jax.block_until_ready(out)
            ref = _ref_sgu(x, gamma, beta, running_mean, running_var, w, b, eps,
                           use_batch_stats)
            assert out.shape == (B, half_ch, L), out.shape
            err = float(jnp.max(jnp.abs(out - ref)))
            assert jnp.allclose(out, ref, atol=1e-4, rtol=1e-4), (case_idx, err)

    print("KERNEL_OK")
</pallas_src>

<mosaic_0001>
module attributes {stable_mosaic.version = 11 : i64} {
  func.func @_sgu_kernel(%arg0: i32, %arg1: memref<2x1x2x16xf32, #tpu.memory_space<vmem>>, %arg2: memref<2x1x2x16xf32, #tpu.memory_space<vmem>>, %arg3: memref<2x1xf32, #tpu.memory_space<vmem>>, %arg4: memref<2x1xf32, #tpu.memory_space<vmem>>, %arg5: memref<16x16xf32, #tpu.memory_space<vmem>>, %arg6: memref<1x16xf32, #tpu.memory_space<vmem>>, %arg7: memref<2x2x16xf32, #tpu.memory_space<vmem>>) attributes {dimension_semantics = [#tpu.dimension_semantics<parallel>], iteration_bounds = array<i64: 1>, scalar_prefetch = 0 : i64, scratch_operands = 0 : i64, tpu.core_type = #tpu.core_type<tc>, window_params = [{transform_indices = @transform_0, window_bounds = array<i64: 2, 1, 2, 16>}, {transform_indices = @transform_1, window_bounds = array<i64: 2, 1, 2, 16>}, {pipeline_mode = #tpu.pipeline_mode<synchronous>, transform_indices = @transform_2, window_bounds = array<i64: 2, 1>}, {pipeline_mode = #tpu.pipeline_mode<synchronous>, transform_indices = @transform_3, window_bounds = array<i64: 2, 1>}, {pipeline_mode = #tpu.pipeline_mode<synchronous>, transform_indices = @transform_4, window_bounds = array<i64: 16, 16>}, {pipeline_mode = #tpu.pipeline_mode<synchronous>, transform_indices = @transform_5, window_bounds = array<i64: 1, 16>}, {transform_indices = @transform_6, window_bounds = array<i64: 2, 2, 16>}]} {
    %c0 = arith.constant 0 : index
    %c0_0 = arith.constant 0 : index
    %0 = vector.load %arg3[%c0, %c0_0] : memref<2x1xf32, #tpu.memory_space<vmem>>, vector<2x1xf32>
    %c0_1 = arith.constant 0 : index
    %c0_2 = arith.constant 0 : index
    %1 = vector.load %arg4[%c0_1, %c0_2] : memref<2x1xf32, #tpu.memory_space<vmem>>, vector<2x1xf32>
    %c0_3 = arith.constant 0 : index
    %c0_4 = arith.constant 0 : index
    %2 = vector.load %arg5[%c0_3, %c0_4] : memref<16x16xf32, #tpu.memory_space<vmem>>, vector<16x16xf32>
    %c0_5 = arith.constant 0 : index
    %c0_6 = arith.constant 0 : index
    %3 = vector.load %arg6[%c0_5, %c0_6] : memref<1x16xf32, #tpu.memory_space<vmem>>, vector<1x16xf32>
    %c0_7 = arith.constant 0 : index
    %c0_8 = arith.constant 0 : index
    %c0_9 = arith.constant 0 : index
    %c0_10 = arith.constant 0 : index
    %4 = vector.load %arg1[%c0_7, %c0_8, %c0_9, %c0_10] : memref<2x1x2x16xf32, #tpu.memory_space<vmem>>, vector<1x1x2x16xf32>
    %5 = vector.shape_cast %4 : vector<1x1x2x16xf32> to vector<2x16xf32>
    %c0_11 = arith.constant 0 : index
    %c0_12 = arith.constant 0 : index
    %c0_13 = arith.constant 0 : index
    %c0_14 = arith.constant 0 : index
    %6 = vector.load %arg2[%c0_11, %c0_12, %c0_13, %c0_14] : memref<2x1x2x16xf32, #tpu.memory_space<vmem>>, vector<1x1x2x16xf32>
    %7 = vector.shape_cast %6 : vector<1x1x2x16xf32> to vector<2x16xf32>
    %8 = vector.broadcast %0 : vector<2x1xf32> to vector<2x16xf32>
    %9 = arith.mulf %7, %8 : vector<2x16xf32>
    %10 = vector.broadcast %1 : vector<2x1xf32> to vector<2x16xf32>
    %11 = arith.addf %9, %10 : vector<2x16xf32>
    %cst = arith.constant dense<0.000000e+00> : vector<2x16xf32>
    %12 = tpu.matmul %11, %2, %cst {dimension_numbers = #tpu.dot_dimension_numbers<[1], [0], [0], [1], [0, 0, 1, 1], [], []>} : vector<2x16xf32>, vector<16x16xf32>, vector<2x16xf32> -> vector<2x16xf32>
    %13 = vector.broadcast %3 : vector<1x16xf32> to vector<2x16xf32>
    %14 = arith.addf %12, %13 : vector<2x16xf32>
    %15 = arith.mulf %5, %14 : vector<2x16xf32>
    %c0_15 = arith.constant 0 : index
    %c0_16 = arith.constant 0 : index
    %c0_17 = arith.constant 0 : index
    %16 = vector.load %arg7[%c0_15, %c0_16, %c0_17] : memref<2x2x16xf32, #tpu.memory_space<vmem>>, vector<1x2x16xf32>
    %17 = vector.shape_cast %16 : vector<1x2x16xf32> to vector<2x16xf32>
    %18 = vector.shape_cast %15 : vector<2x16xf32> to vector<1x2x16xf32>
    tpu.vector_store %arg7[%c0_15, %c0_16, %c0_17], %18 {strides = array<i32>} : memref<2x2x16xf32, #tpu.memory_space<vmem>>, vector<1x2x16xf32>,
    %c1 = arith.constant 1 : index
    %c0_18 = arith.constant 0 : index
    %c0_19 = arith.constant 0 : index
    %c0_20 = arith.constant 0 : index
    %19 = vector.load %arg1[%c1, %c0_18, %c0_19, %c0_20] : memref<2x1x2x16xf32, #tpu.memory_space<vmem>>, vector<1x1x2x16xf32>
    %20 = vector.shape_cast %19 : vector<1x1x2x16xf32> to vector<2x16xf32>
    %c1_21 = arith.constant 1 : index
    %c0_22 = arith.constant 0 : index
    %c0_23 = arith.constant 0 : index
    %c0_24 = arith.constant 0 : index
    %21 = vector.load %arg2[%c1_21, %c0_22, %c0_23, %c0_24] : memref<2x1x2x16xf32, #tpu.memory_space<vmem>>, vector<1x1x2x16xf32>
    %22 = vector.shape_cast %21 : vector<1x1x2x16xf32> to vector<2x16xf32>
    %23 = vector.broadcast %0 : vector<2x1xf32> to vector<2x16xf32>
    %24 = arith.mulf %22, %23 : vector<2x16xf32>
    %25 = vector.broadcast %1 : vector<2x1xf32> to vector<2x16xf32>
    %26 = arith.addf %24, %25 : vector<2x16xf32>
    %cst_25 = arith.constant dense<0.000000e+00> : vector<2x16xf32>
    %27 = tpu.matmul %26, %2, %cst_25 {dimension_numbers = #tpu.dot_dimension_numbers<[1], [0], [0], [1], [0, 0, 1, 1], [], []>} : vector<2x16xf32>, vector<16x16xf32>, vector<2x16xf32> -> vector<2x16xf32>
    %28 = vector.broadcast %3 : vector<1x16xf32> to vector<2x16xf32>
    %29 = arith.addf %27, %28 : vector<2x16xf32>
    %30 = arith.mulf %20, %29 : vector<2x16xf32>
    %c1_26 = arith.constant 1 : index
    %c0_27 = arith.constant 0 : index
    %c0_28 = arith.constant 0 : index
    %31 = vector.load %arg7[%c1_26, %c0_27, %c0_28] : memref<2x2x16xf32, #tpu.memory_space<vmem>>, vector<1x2x16xf32>
    %32 = vector.shape_cast %31 : vector<1x2x16xf32> to vector<2x16xf32>
    %33 = vector.shape_cast %30 : vector<2x16xf32> to vector<1x2x16xf32>
    tpu.vector_store %arg7[%c1_26, %c0_27, %c0_28], %33 {strides = array<i32>} : memref<2x2x16xf32, #tpu.memory_space<vmem>>, vector<1x2x16xf32>,
    return
  }
  func.func @transform_0(%arg0: i32) -> (i32, i32, i32, i32) {
    %c0_i32 = arith.constant 0 : i32
    %c0_i32_0 = arith.constant 0 : i32
    %c0_i32_1 = arith.constant 0 : i32
    %c0_i32_2 = arith.constant 0 : i32
    return %arg0, %c0_i32, %c0_i32_0, %c0_i32_1 : i32, i32, i32, i32
  }
  func.func @transform_1(%arg0: i32) -> (i32, i32, i32, i32) {
    %c1_i32 = arith.constant 1 : i32
    %c0_i32 = arith.constant 0 : i32
    %c0_i32_0 = arith.constant 0 : i32
    %c0_i32_1 = arith.constant 0 : i32
    return %arg0, %c1_i32, %c0_i32, %c0_i32_0 : i32, i32, i32, i32
  }
  func.func @transform_2(%arg0: i32) -> (i32, i32) {
    %c0_i32 = arith.constant 0 : i32
    %c0_i32_0 = arith.constant 0 : i32
    %c0_i32_1 = arith.constant 0 : i32
    return %c0_i32, %c0_i32_0 : i32, i32
  }
  func.func @transform_3(%arg0: i32) -> (i32, i32) {
    %c0_i32 = arith.constant 0 : i32
    %c0_i32_0 = arith.constant 0 : i32
    %c0_i32_1 = arith.constant 0 : i32
    return %c0_i32, %c0_i32_0 : i32, i32
  }
  func.func @transform_4(%arg0: i32) -> (i32, i32) {
    %c0_i32 = arith.constant 0 : i32
    %c0_i32_0 = arith.constant 0 : i32
    %c0_i32_1 = arith.constant 0 : i32
    return %c0_i32, %c0_i32_0 : i32, i32
  }
  func.func @transform_5(%arg0: i32) -> (i32, i32) {
    %c0_i32 = arith.constant 0 : i32
    %c0_i32_0 = arith.constant 0 : i32
    %c0_i32_1 = arith.constant 0 : i32
    return %c0_i32, %c0_i32_0 : i32, i32
  }
  func.func @transform_6(%arg0: i32) -> (i32, i32, i32) {
    %c0_i32 = arith.constant 0 : i32
    %c0_i32_0 = arith.constant 0 : i32
    %c0_i32_1 = arith.constant 0 : i32
    return %arg0, %c0_i32, %c0_i32_0 : i32, i32, i32
  }
}

</mosaic_0001>

<bundles_post_ra>
// kernel: tpu_custom_call.1
= control target key start
LH: loop header
LB: loop body
LE: loop exit
PB: predicated region body
PF: predicated region fallthrough
CT: control target
= control target key end

     0   :  { %11 = vsyncpa [#allocation3], 0  ;;  %s468_s0 = inlined_call_operand.hbm [shape: f32[2,2,2,16], index: 0, kind: input, shape index: {}]   ;;  %s469_s1 = inlined_call_operand.hbm [shape: f32[2,2,2,16], index: 1, kind: input, shape index: {}]   ;;  %s470_s2 = inlined_call_operand.vmem [shape: f32[2,1], index: 2, kind: input, shape index: {}]   ;;  %s471_s3 = inlined_call_operand.vmem [shape: f32[2,1], index: 3, kind: input, shape index: {}]   ;;  %s472_s4 = inlined_call_operand.hbm [shape: f32[16,16], index: 4, kind: input, shape index: {}]   ;;  %s473_s5 = inlined_call_operand.vmem [shape: f32[1,16], index: 5, kind: input, shape index: {}]   ;;  %s474_s6 = inlined_call_operand.hbm [shape: f32[2,2,16], index: 6, kind: output, shape index: {}]  }
   0x1   :  { %12 = vsyncpa [#allocation6], 0 }
   0x2   :  { %13 = vsyncpa [#allocation4], 0  ;;  %s31_s23 = scalar_lea.hbm %s469_s1, 32  ;;  %s393_s24 = smov [#allocation5]  }
   0x3   :  { %s32_s25 = sshll.u32 %s393_s24, 4  ;;  %s394_s26 = smov [#allocation2]   ;;  %s33_s25 = int_to_ptr.vmem [resolvable:$true] %s32_s25 }
   0x4   :  { %s19_s27 = sshll.u32 %s394_s26, 4  ;;  %s314_s28 = scalar_lea.vmem %s33_s25, 64  ;;  %s20_s27 = int_to_ptr.vmem [resolvable:$true] %s19_s27 }
   0x5   :  { %p315_p0 = scmp.ne.s32.totalorder %s33_s25, %s314_s28  ;;  %p319_p1 = scmp.lt.s32.totalorder %s33_s25, %s33_s25 }
   0x6   :  { %p320_p2 = scmp.lt.s32.totalorder %s314_s28, %s314_s28 }
   0x8   :  { %p321_p3 = por %p320_p2, %p319_p1 }
   0xa   :  { %p322_p4 = pnand %p321_p3, %p315_p0 }
   0xc   :  { %325 = shalt.err (!%p322_p4)
}
   0xd   :  { %s395_s29 = smov 64   ;;  %s396_s30 = smov 32  }
   0xe   :  { %s397_s7 = smov 2   ;;  %s335_s1 = scalar_lea.vmem %s20_s27, 64 }
   0xf   :  { %38 = dma.hbm_to_vmem [thread:$0]  %s31_s23, 64, %s33_s25, [#allocation6], %s395_s29, %s396_s30, %s397_s7  }
  0x10   :  { %p336_p5 = scmp.ne.s32.totalorder %s20_s27, %s335_s1  ;;  %p340_p6 = scmp.lt.s32.totalorder %s20_s27, %s20_s27 }
  0x11   :  { %p341_p7 = scmp.lt.s32.totalorder %s335_s1, %s335_s1 }
  0x13   :  { %p342_p8 = por %p341_p7, %p340_p6 }
  0x15   :  { %p343_p9 = pnand %p342_p8, %p336_p5 }
  0x17   :  { %346 = shalt.err (!%p343_p9)
}
  0x18   :  { %25 = dma.hbm_to_vmem [thread:$0]  %s468_s0, 64, %s20_s27, [#allocation3], %s395_s29, %s396_s30, %s397_s7  }
  0x19   :  { %s398_s10 = smov [#allocation7]  }
  0x1a   :  { %s48_s11 = sshll.u32 %s398_s10, 4  ;;  %s49_s11 = int_to_ptr.vmem [resolvable:$true] %s48_s11 }
  0x1b   :  { %s355_s12 = scalar_lea.vmem %s49_s11, 256  ;;  %p360_p11 = scmp.lt.s32.totalorder %s49_s11, %s49_s11 }
  0x1c   :  { %p356_p10 = scmp.ne.s32.totalorder %s49_s11, %s355_s12  ;;  %p361_p12 = scmp.lt.s32.totalorder %s355_s12, %s355_s12 }
  0x1e   :  { %p362_p13 = por %p361_p12, %p360_p11 }
  0x20   :  { %p363_p0 = pnand %p362_p13, %p356_p10 }
  0x22   :  { %366 = shalt.err (!%p363_p0)
}
  0x23   :  { %s399_s13 = smov 128   ;;  %s400_s14 = smov 8  }
  0x24   :  { %54 = dma.hbm_to_vmem [thread:$0]  %s472_s4, 256, %s49_s11, [#allocation6], %s399_s13, %s399_s13, %s400_s14  }
  0x25   :  { %387 = dma.done.wait [#allocation3], 64  }
  0x26   :  { %388 = vsyncadd [#allocation3], 4294967232 }
  0x27   :  { %389 = dma.done.wait [#allocation6], 320  }
  0x28   :  { %390 = vsyncadd [#allocation6], 4294966976  ;;  %v401_v0 = vmov 0   ;;  %v402_v1 = vmov 0.0   ;;  %v66_v2 = vld [vmem:[%s470_s2] sm:$0x3] }
  0x29   :  { %303 = vset.pattern.permute.xlu0 %v401_v0  ;;  %277 = vmatprep.subr.mxu0 %v402_v1  ;;  %v69_v3 = vld [vmem:[#allocation7 + $0x8] sm:$0xff]  ;;  %v68_v4 = vld [vmem:[#allocation7] sm:$0xff]  ;;  %v67_v5 = vld [vmem:[%s471_s3] sm:$0x3]  ;;  %vm403_vm0 = vmmov 0   ;;  %vm91_vm1 = vcmask 130048  }
  0x2a   :  { %284 = vmatprep.subr.mxu1 %v402_v1  ;;  %75 = vperm.xlu0 %303, %v66_v2   ;;  %v72_v6 = vld [vmem:[#allocation5] sm:$0x3]  ;;  %v171_v7 = vld [vmem:[#allocation5 + $0x2] sm:$0x3]  ;;  %v268_v14 = vld [vmem:[%s473_s5] ss:$0 sm:$0xff] }
  0x2b   :  { %278 = vmatpush3.msra.mxu0 %v69_v3  ;;  %285 = vmatpush3.msra.mxu1 %v69_v3  ;;  %v71_v15 = vld [vmem:[#allocation2] sm:$0x3]  ;;  %v169_v17 = vld [vmem:[#allocation2 + $0x2] sm:$0x3]  ;;  %s404_s4 = smov [#allocation8]   ;;  %vm166_vm2 = vcmask 123904  }
  0x2c   :  { %279 = vmatprep.subr.mxu0 %v402_v1  ;;  %286 = vmatprep.subr.mxu1 %v402_v1  ;;  %s255_s20 = sshll.u32 %s404_s4, 4  ;;  %s256_s20 = int_to_ptr.vmem [resolvable:$true] %s255_s20 }
  0x2d   :  { %280 = vmatpush3.msra.mxu0 %v68_v4  ;;  %281 = vmatprep.mubr.msk.f32.mxu0 %vm403_vm0, %v402_v1  ;;  %s367_s21 = scalar_lea.vmem %s256_s20, 64  ;;  %p372_p2 = scmp.lt.s32.totalorder %s256_s20, %s256_s20 }
  0x2e   :  { %81 = vperm.xlu0 %303, %v67_v5   ;;  %287 = vmatpush3.msra.mxu1 %v68_v4  ;;  %p368_p1 = scmp.ne.s32.totalorder %s256_s20, %s367_s21  ;;  %p373_p3 = scmp.lt.s32.totalorder %s367_s21, %s367_s21 }
  0x2f   :  { %288 = vmatprep.mubr.msk.f32.mxu1 %vm403_vm0, %v402_v1 }
  0x30   :  { %p374_p4 = por %p373_p3, %p372_p2 }
  0x32   :  { %p375_p5 = pnand %p374_p4, %p368_p1 }
  0xa5   :  { %v76_v8 = vpop.permute.xlu0 %75 }
  0xa6   :  { %v78_v9 = vmul.f32 %v76_v8, %v72_v6  ;;  %v172_v10 = vmul.f32 %v171_v7, %v76_v8 }
  0xa9   :  { %v82_v11 = vpop.permute.xlu0 %81 }
  0xaa   :  { %v84_v12 = vadd.f32 %v82_v11, %v78_v9  ;;  %v173_v13 = vadd.f32 %v172_v10, %v82_v11 }
  0xac   :  { %282 = vmatmul.mubr.msk.f32.vlgmr.msra.gmra.mxu0 %vm91_vm1, %v84_v12  ;;  %289 = vmatmul.mubr.msk.f32.vlgmr.msra.gmra.mxu1 %vm91_vm1, %v173_v13 }
 0x16c   :  { %v161_v16 = vpop.f32.mrf.mxu0  ;;  %v243_v18 = vpop.f32.mrf.mxu1 }
 0x16d   :  { %v162_v19 = vadd.f32 %v268_v14, %v161_v16  ;;  %v244_v20 = vadd.f32 %v268_v14, %v243_v18 }
 0x16e   :  { %v283_v21 = vpop.f32.mrf.mxu0  ;;  %v290_v22 = vpop.f32.mrf.mxu1 }
 0x16f   :  { %v165_v23 = vmul.f32 %v162_v19, %v71_v15  ;;  %v247_v24 = vmul.f32 %v244_v20, %v169_v17 }
 0x171   :  { %167 = vst.msk [vmem:[#allocation8] sm:$0x3] %vm166_vm2, %v165_v23  ;;  %249 = vst.msk [vmem:[#allocation8 + $0x2] sm:$0x3] %vm166_vm2, %v247_v24 }
 0x172   :  { %378 = shalt.err (!%p375_p5)
}
 0x173   :  { %261 = dma.vmem_to_hbm [thread:$0]  %s256_s20, 64, %s474_s6, [#allocation4], %s396_s30, %s396_s30, %s397_s7  }
 0x174   :  { %391 = dma.done.wait [#allocation4], 64  }
 0x175   :  { %392 = vsyncadd [#allocation4], 4294967232 }
 0x176   :  { %265 = vsyncpa [#allocation3], 1 }
 0x177   :  { %266 = vsyncpa [#allocation6], 1 }
 0x178   :  { %267 = vsyncpa [#allocation4], 1 }

</bundles_post_ra>
